<compile_context>
chip_gen: v7x
topology: tpu7x:2x2x1
jax: 0.10.0
libtpu: 0.0.40
codegen_flags: <defaults>
</compile_context>

<pallas_src>
import functools

import jax
import jax.numpy as jnp
import numpy as np
from jax.experimental import pallas as pl
from jax.experimental.pallas import tpu as pltpu


FPAD = 128                    # padded feature width (lane-dense, MXU-friendly)
TILE_N = 256                  # row / k tile for the (N, N) adjacency matmuls
TILE_B = 128                  # batch row tile for the fused head kernel
VMEM_LIMIT = 64 * 1024 * 1024


def _round_up(x, m):
    return (x + m - 1) // m * m


def _pad2(x, rows, cols):
    r, c = x.shape
    return jnp.pad(x, ((0, rows - r), (0, cols - c)))


# ----------------------------------------------------------------------------
# Kernel 1: square + project    G = (f * f) @ Wt       (row-tiled, "parallel")
# ----------------------------------------------------------------------------
def _square_project_kernel(f_ref, w_ref, o_ref):
    f = f_ref[...]
    sq = (f * f).astype(jnp.bfloat16)           # torch.mul(features, features)
    o_ref[...] = jnp.dot(sq, w_ref[...],
                         preferred_element_type=jnp.float32).astype(o_ref.dtype)


def square_project(feat_pad, wt_pad):
    n, fin = feat_pad.shape
    fout = wt_pad.shape[1]
    tm = TILE_N
    return pl.pallas_call(
        _square_project_kernel,
        out_shape=jax.ShapeDtypeStruct((n, fout), jnp.bfloat16),
        grid=(n // tm,),
        in_specs=[
            pl.BlockSpec((tm, fin), lambda i: (i, 0)),
            pl.BlockSpec((fin, fout), lambda i: (0, 0)),
        ],
        out_specs=pl.BlockSpec((tm, fout), lambda i: (i, 0)),
        compiler_params=pltpu.CompilerParams(
            dimension_semantics=("parallel",),
            vmem_limit_bytes=VMEM_LIMIT),
    )(feat_pad, wt_pad)


# ----------------------------------------------------------------------------
# Kernel 2: tiled propagation   out = [ReLU]( L @ X + bias )
#   grid = (row_tiles, k_tiles); reduction (k) axis last; f32 VMEM accumulator
# ----------------------------------------------------------------------------
def _propagate_kernel(L_ref, x_ref, b_ref, o_ref, acc_ref, *, apply_relu):
    k = pl.program_id(1)

    @pl.when(k == 0)
    def _init():
        acc_ref[...] = jnp.zeros_like(acc_ref)

    acc_ref[...] += jnp.dot(L_ref[...], x_ref[...],
                            preferred_element_type=jnp.float32)

    @pl.when(k == pl.num_programs(1) - 1)
    def _finalize():
        r = acc_ref[...] + b_ref[...]
        if apply_relu:
            r = jnp.maximum(r, 0.0)
        o_ref[...] = r.astype(o_ref.dtype)


def propagate(L_pad, x_pad, bias_pad, *, apply_relu, out_dtype):
    n = L_pad.shape[0]
    f = x_pad.shape[1]
    tm = tk = TILE_N
    return pl.pallas_call(
        functools.partial(_propagate_kernel, apply_relu=apply_relu),
        out_shape=jax.ShapeDtypeStruct((n, f), out_dtype),
        grid=(n // tm, n // tk),
        in_specs=[
            pl.BlockSpec((tm, tk), lambda i, k: (i, k)),   # L tile (bf16)
            pl.BlockSpec((tk, f), lambda i, k: (k, 0)),    # X tile (bf16)
            pl.BlockSpec((1, f), lambda i, k: (0, 0)),     # bias
        ],
        out_specs=pl.BlockSpec((tm, f), lambda i, k: (i, 0)),
        scratch_shapes=[pltpu.VMEM((tm, f), jnp.float32)],
        compiler_params=pltpu.CompilerParams(
            dimension_semantics=("parallel", "arbitrary"),
            vmem_limit_bytes=VMEM_LIMIT),
    )(L_pad, x_pad, bias_pad)


# ----------------------------------------------------------------------------
# Kernel 3: fused batch head
#   mf   = u_mf * i_mf
#   mlp  = ReLU-MLP( [u_mlp | i_mlp] )   (first Linear split over the halves)
#   ngcf = finalEmbd[user] * finalEmbd[item]
#   out  = [mf | mlp | ngcf] @ Wout^T + bout   (3 row-vector reductions)
# ----------------------------------------------------------------------------
def _head_kernel(umf_ref, imf_ref, umlp_ref, imlp_ref, gu_ref, gi_ref,
                 w1u_ref, w1i_ref, b1_ref, w2_ref, b2_ref,
                 w3_ref, b3_ref, w4_ref, b4_ref,
                 womf_ref, womlp_ref, wog_ref, bo_ref, o_ref):
    mf = umf_ref[...] * imf_ref[...]

    x = (jnp.dot(umlp_ref[...], w1u_ref[...], preferred_element_type=jnp.float32)
         + jnp.dot(imlp_ref[...], w1i_ref[...], preferred_element_type=jnp.float32)
         + b1_ref[...])
    x = jnp.maximum(x, 0.0)
    x = jnp.maximum(jnp.dot(x, w2_ref[...], preferred_element_type=jnp.float32)
                    + b2_ref[...], 0.0)
    x = jnp.maximum(jnp.dot(x, w3_ref[...], preferred_element_type=jnp.float32)
                    + b3_ref[...], 0.0)
    mlp = jnp.maximum(jnp.dot(x, w4_ref[...], preferred_element_type=jnp.float32)
                      + b4_ref[...], 0.0)

    ngcf = gu_ref[...] * gi_ref[...]

    o_ref[...] = (jnp.sum(mf * womf_ref[...], axis=1, keepdims=True)
                  + jnp.sum(mlp * womlp_ref[...], axis=1, keepdims=True)
                  + jnp.sum(ngcf * wog_ref[...], axis=1, keepdims=True)
                  + bo_ref[...])


def fused_head(umf, imf, umlp, imlp, gu, gi, mlp_params, out_w_parts, out_b):
    bpad, e = umf.shape
    dg = gu.shape[1]
    tb = TILE_B
    (w1u, w1i, b1), (w2, b2), (w3, b3), (w4, b4) = mlp_params
    womf, womlp, wog = out_w_parts

    def rows(width):
        return pl.BlockSpec((tb, width), lambda i: (i, 0))

    def whole(a):
        return pl.BlockSpec(a.shape, lambda i: (0, 0))

    return pl.pallas_call(
        _head_kernel,
        out_shape=jax.ShapeDtypeStruct((bpad, 1), jnp.float32),
        grid=(bpad // tb,),
        in_specs=[rows(e), rows(e), rows(e), rows(e), rows(dg), rows(dg),
                  whole(w1u), whole(w1i), whole(b1),
                  whole(w2), whole(b2), whole(w3), whole(b3),
                  whole(w4), whole(b4),
                  whole(womf), whole(womlp), whole(wog), whole(out_b)],
        out_specs=pl.BlockSpec((tb, 1), lambda i: (i, 0)),
        compiler_params=pltpu.CompilerParams(
            dimension_semantics=("parallel",),
            vmem_limit_bytes=VMEM_LIMIT),
    )(umf, imf, umlp, imlp, gu, gi, w1u, w1i, b1, w2, b2, w3, b3, w4, b4,
      womf, womlp, wog, out_b)


# ----------------------------------------------------------------------------
# Parameters (deterministic init mirroring the PyTorch __init__)
# ----------------------------------------------------------------------------
def init_params(key, user_num, item_num, embed_size, layers):
    assert layers[0] == embed_size, "NGCF usage requires layers[0] == embedSize"
    keys = iter(jax.random.split(key, 64))

    def nrm(shape):
        return 0.01 * jax.random.normal(next(keys), shape, jnp.float32)

    def xavier(fan_out, fan_in):
        bound = float(np.sqrt(6.0 / (fan_in + fan_out)))
        return jax.random.uniform(next(keys), (fan_out, fan_in), jnp.float32,
                                  -bound, bound)

    p = {}
    # NGCF trunk embeddings + GNN linears (weight stored transposed: (inF,outF))
    p["ngcf_u"] = nrm((user_num, embed_size))
    p["ngcf_i"] = nrm((item_num, embed_size))
    gnn = []
    for inF, outF in zip(layers[:-1], layers[1:]):
        w = xavier(outF, inF)          # torch Linear weight (out, in)
        _ = xavier(outF, inF)          # interActTransform: built but unused in forward
        gnn.append((w.T, jnp.zeros((1, outF), jnp.float32)))
    p["gnn"] = gnn

    # MF embeddings
    p["mf_u"] = nrm((user_num, embed_size))
    p["mf_i"] = nrm((item_num, embed_size))

    # MLP embeddings + 4 Linear layers: 2E -> 8E -> 4E -> 2E -> E
    p["mlp_u"] = nrm((user_num, embed_size))
    p["mlp_i"] = nrm((item_num, embed_size))
    e = embed_size
    dims = [2 * e, 8 * e, 4 * e, 2 * e, e]
    mlp = []
    for din, dout in zip(dims[:-1], dims[1:]):
        w = xavier(dout, din)
        mlp.append((w.T, jnp.zeros((1, dout), jnp.float32)))
    p["mlp"] = mlp

    # Output Linear: (sum(layers) + 2E) -> 1
    d_total = sum(layers) + 2 * e
    p["out_w"] = xavier(1, d_total)                    # (1, d_total)
    p["out_b"] = jnp.zeros((1, 1), jnp.float32)
    return p


def build_adjacency(user_num, item_num, seed=0):
    """Deterministic dense symmetric-normalized bipartite adjacency (stand-in
    for the sparse LaplacianMat handed to the PyTorch module)."""
    n = user_num + item_num
    rng = np.random.RandomState(seed)
    r = (rng.rand(user_num, item_num) < 0.05).astype(np.float32)
    a = np.zeros((n, n), np.float32)
    a[:user_num, user_num:] = r
    a[user_num:, :user_num] = r.T
    a += np.eye(n, dtype=np.float32)
    d = a.sum(axis=1)
    d_inv_sqrt = 1.0 / np.sqrt(np.maximum(d, 1e-12))
    return jnp.asarray((a * d_inv_sqrt[:, None]) * d_inv_sqrt[None, :], jnp.float32)


# ----------------------------------------------------------------------------
# Forward pass
# ----------------------------------------------------------------------------
def ngcfmf_concat_mf_mlp_forward(user_idx, item_idx, params, L, user_num):
    p = params
    e = p["ngcf_u"].shape[1]
    n = p["ngcf_u"].shape[0] + p["ngcf_i"].shape[0]

    # ----- NGCF trunk (tiled Pallas kernels, 128-padded lane-dense features) -
    feat0 = jnp.concatenate([p["ngcf_u"], p["ngcf_i"]], axis=0)       # (N, E)
    npad = _round_up(max(n, TILE_N), TILE_N)
    L_pad = _pad2(L, npad, npad).astype(jnp.bfloat16)                 # bf16 MXU input
    feat_pad = _pad2(feat0, npad, FPAD)                               # f32
    zero_bias = jnp.zeros((1, FPAD), jnp.float32)

    pieces = [feat0]
    for wt, b in p["gnn"]:
        inF, outF = wt.shape
        wt_pad = (jnp.zeros((FPAD, FPAD), jnp.float32)
                  .at[:inF, :outF].set(wt).astype(jnp.bfloat16))
        b_pad = jnp.zeros((1, FPAD), jnp.float32).at[:, :outF].set(b)
        # Reassociated layer:  ReLU( L @ (L @ ((f*f) @ Wt)) + b )
        g = square_project(feat_pad, wt_pad)                          # (npad,128) bf16
        h = propagate(L_pad, g, zero_bias, apply_relu=False,
                      out_dtype=jnp.bfloat16)                         # L @ g
        feat_pad = propagate(L_pad, h, b_pad, apply_relu=True,
                             out_dtype=jnp.float32)                   # ReLU(L @ h + b)
        pieces.append(feat_pad[:n, :outF])
    final_embd = jnp.concatenate(pieces, axis=1)                      # (N, sum(layers))

    # ----- gathers (plain-JAX glue) ------------------------------------------
    gu = jnp.take(final_embd, user_idx, axis=0)
    gi = jnp.take(final_embd, item_idx + user_num, axis=0)
    umf = jnp.take(p["mf_u"], user_idx, axis=0)
    imf = jnp.take(p["mf_i"], item_idx, axis=0)
    umlp = jnp.take(p["mlp_u"], user_idx, axis=0)
    imlp = jnp.take(p["mlp_i"], item_idx, axis=0)

    batch = user_idx.shape[0]
    bpad = _round_up(max(batch, TILE_B), TILE_B)

    def padrows(x):
        return jnp.pad(x, ((0, bpad - batch), (0, 0)))

    # Split the first MLP Linear over the user/item halves of the concat, and
    # the output Linear over the (mf | mlp | ngcf) segments -> no in-kernel concat.
    (w1, b1), rest = p["mlp"][0], p["mlp"][1:]
    mlp_params = ((w1[:e, :], w1[e:, :], b1),) + tuple(rest)
    wo = p["out_w"]
    out_w_parts = (wo[:, :e], wo[:, e:2 * e], wo[:, 2 * e:])

    scores = fused_head(padrows(umf), padrows(imf), padrows(umlp), padrows(imlp),
                        padrows(gu), padrows(gi),
                        mlp_params, out_w_parts, p["out_b"])
    return scores[:batch, 0]                                          # .flatten()


# ----------------------------------------------------------------------------
# Plain-JAX f32 reference (original, un-reassociated op order) for validation
# ----------------------------------------------------------------------------
def reference_forward(user_idx, item_idx, params, L, user_num):
    p = params
    feat = jnp.concatenate([p["ngcf_u"], p["ngcf_i"]], axis=0)
    final = feat
    for wt, b in p["gnn"]:
        sq = feat * feat
        inter = L @ sq
        feat = jax.nn.relu((L @ inter) @ wt + b)
        final = jnp.concatenate([final, feat], axis=1)
    ngcf = final[user_idx] * final[item_idx + user_num]
    mf = p["mf_u"][user_idx] * p["mf_i"][item_idx]
    x = jnp.concatenate([p["mlp_u"][user_idx], p["mlp_i"][item_idx]], axis=1)
    for wt, b in p["mlp"]:
        x = jax.nn.relu(x @ wt + b)
    concat = jnp.concatenate([mf, x, ngcf], axis=1)
    return (concat @ p["out_w"].T + p["out_b"]).reshape(-1)


# ----------------------------------------------------------------------------
if __name__ == "__main__":
    user_num, item_num = 192, 256      # N = 448 -> padded to 512 (2x2 grid of 256 tiles)
    embed_size = 32
    layers = [32, 32, 16]              # layers[0] == embed_size (as in NGCF usage)
    batch = 64

    key = jax.random.PRNGKey(0)
    k_params, k_u, k_i = jax.random.split(key, 3)
    params = init_params(k_params, user_num, item_num, embed_size, layers)
    L = build_adjacency(user_num, item_num, seed=0)

    user_idx = jax.random.randint(k_u, (batch,), 0, user_num, dtype=jnp.int32)
    item_idx = jax.random.randint(k_i, (batch,), 0, item_num, dtype=jnp.int32)

    out = ngcfmf_concat_mf_mlp_forward(user_idx, item_idx, params, L, user_num)
    jax.block_until_ready(out)

    assert out.shape == (batch,), out.shape
    assert out.dtype == jnp.float32
    assert bool(jnp.all(jnp.isfinite(out)))

    # Loose check vs a plain-JAX f32 reference (the kernel uses bf16 MXU inputs
    # and a reassociated matmul chain, so exact bitwise match is not expected).
    ref = reference_forward(user_idx, item_idx, params, L, user_num)
    np.testing.assert_allclose(np.asarray(out), np.asarray(ref),
                               rtol=5e-2, atol=1e-4)

    print("KERNEL_OK")
</pallas_src>

<mosaic_0001>
module attributes {stable_mosaic.version = 11 : i64} {
  func.func @_square_project_kernel(%arg0: i32, %arg1: memref<256x128xf32, #tpu.memory_space<vmem>>, %arg2: memref<128x128xbf16, #tpu.memory_space<vmem>>, %arg3: memref<256x128xbf16, #tpu.memory_space<vmem>>) attributes {dimension_semantics = [#tpu.dimension_semantics<parallel>], iteration_bounds = array<i64: 2>, scalar_prefetch = 0 : i64, scratch_operands = 0 : i64, tpu.core_type = #tpu.core_type<tc>, window_params = [{transform_indices = @transform_0, window_bounds = array<i64: 256, 128>}, {pipeline_mode = #tpu.pipeline_mode<synchronous>, transform_indices = @transform_1, window_bounds = array<i64: 128, 128>}, {transform_indices = @transform_2, window_bounds = array<i64: 256, 128>}]} {
    %c0 = arith.constant 0 : index
    %c0_0 = arith.constant 0 : index
    %0 = vector.load %arg1[%c0, %c0_0] : memref<256x128xf32, #tpu.memory_space<vmem>>, vector<256x128xf32>
    %1 = arith.mulf %0, %0 : vector<256x128xf32>
    %2 = arith.truncf %1 : vector<256x128xf32> to vector<256x128xbf16>
    %c0_1 = arith.constant 0 : index
    %c0_2 = arith.constant 0 : index
    %3 = vector.load %arg2[%c0_1, %c0_2] : memref<128x128xbf16, #tpu.memory_space<vmem>>, vector<128x128xbf16>
    %cst = arith.constant dense<0.000000e+00> : vector<256x128xf32>
    %4 = tpu.matmul %2, %3, %cst {dimension_numbers = #tpu.dot_dimension_numbers<[1], [0], [0], [1], [0, 0, 1, 1], [], []>} : vector<256x128xbf16>, vector<128x128xbf16>, vector<256x128xf32> -> vector<256x128xf32>
    %5 = arith.truncf %4 : vector<256x128xf32> to vector<256x128xbf16>
    %c0_3 = arith.constant 0 : index
    %c0_4 = arith.constant 0 : index
    %6 = vector.load %arg3[%c0_3, %c0_4] : memref<256x128xbf16, #tpu.memory_space<vmem>>, vector<256x128xbf16>
    tpu.vector_store %arg3[%c0_3, %c0_4], %5 {strides = array<i32>} : memref<256x128xbf16, #tpu.memory_space<vmem>>, vector<256x128xbf16>,
    return
  }
  func.func @transform_0(%arg0: i32) -> (i32, i32) {
    %c0_i32 = arith.constant 0 : i32
    %c0_i32_0 = arith.constant 0 : i32
    return %arg0, %c0_i32 : i32, i32
  }
  func.func @transform_1(%arg0: i32) -> (i32, i32) {
    %c0_i32 = arith.constant 0 : i32
    %c0_i32_0 = arith.constant 0 : i32
    %c0_i32_1 = arith.constant 0 : i32
    return %c0_i32, %c0_i32_0 : i32, i32
  }
  func.func @transform_2(%arg0: i32) -> (i32, i32) {
    %c0_i32 = arith.constant 0 : i32
    %c0_i32_0 = arith.constant 0 : i32
    return %arg0, %c0_i32 : i32, i32
  }
}

</mosaic_0001>

<bundles_post_ra>
// kernel: tpu_custom_call.1
= control target key start
LH: loop header
LB: loop body
LE: loop exit
PB: predicated region body
PF: predicated region fallthrough
CT: control target
= control target key end

     0   :  { %7 = vsyncpa [#allocation3], 0  ;;  %s1495_s0 = inlined_call_operand.hbm [shape: f32[512,128], index: 0, kind: input, shape index: {}]   ;;  %s1496_s1 = inlined_call_operand.hbm [shape: bf16[128,128], index: 1, kind: input, shape index: {}]   ;;  %s1497_s2 = inlined_call_operand.hbm [shape: bf16[512,128], index: 2, kind: output, shape index: {}]  }
   0x1   :  { %9 = vsyncpa [#allocation3 + $0x1], 0 }
   0x2   :  { %10 = vsyncpa [#allocation6], 0 }
   0x3   :  { %11 = vsyncpa [#allocation4], 0 }
   0x4   :  { %13 = vsyncpa [#allocation4 + $0x1], 0  ;;  %s1240_s9 = smov 0   ;;  %s1242_s10 = smov 0  }
   0x5   :  { %s1244_s11 = smov 0   ;;  %s1246_s12 = smov 0  }
   0x6 LB: > { %s1261_s13 = sadd.s32 4294967295, %s1214_s12   ;;  %s742_s14 = sadd.s32 4294967294, %s1214_s12   ;;  %s1214_s12 = sphi %s1246_s12, %s1517_s12   ;;  %s1210_s11 = sphi %s1244_s11, %s1516_s11   ;;  %s1206_s10 = sphi %s1242_s10, %s1515_s10   ;;  %s1202_s9 = sphi %s1240_s9, %s1514_s9  }
   0x7   : > { %p39_p0 = scmp.ne.s32.totalorder %s1206_s10, %s1202_s9  ;;  %p1498_p1 = scmp.eq.s32.totalorder %s1261_s13, 0 }
   0x8   : > { %p90_p3 = scmp.eq.s32.totalorder %s742_s14, 1  ;;  %p743_p5 = scmp.ge.s32.totalorder %s1214_s12, 1 }
   0x9   : > { %p1270_p4 = por %p1498_p1, %p39_p0  ;;  %p97_p7 = scmp.lt.s32.totalorder %s1214_s12, 3 }
   0xa   : > { %p1275_p6 = por %p90_p3, %p39_p0  ;;  %s1216_s18 = smov [#allocation5]  }
   0xb   : > { %s1501_s15 = scalar_select %p1270_p4, 1, 0 }
   0xc   : > { %s1502_s16 = scalar_select %p1275_p6, 1, 0 }
   0xd   : > { %p1280_p8 = pnand %p743_p5, %p97_p7  ;;  %s109_s19 = sshll.u32 %s1216_s18, 4  ;;  %s1284_s19 = int_to_ptr.vmem [resolvable:$true] %s109_s19 }
   0xe   : > { %s1296_s21 = sadd.s32 1, %s1214_s12   ;;  %s26_s22 = sadd.s32 1, %s1210_s11 }
   0xf   : > { %s1503_s17 = scalar_select %p1280_p8, 1, 0 }
  0x10   : > { %p1023_p9 = pneg %p1280_p8  ;;  %s23_s23 = ssub.s32 %s1214_s12, %s1296_s21 }
  0x11   : > { %s1086_s26 = scalar_lea.hbm %s1496_s1, 1024 }
  0x12   : > { %p1291_p11 = pnand %p1023_p9, %p1498_p1  ;;  %p1087_p12 = scmp.ne.s32.totalorder %s1496_s1, %s1086_s26 }
  0x13   : > { %p1093_p5 = scmp.lt.u32.totalorder %s1086_s26, %s1496_s1 }
  0x14   : > { %p1088_p13 = pneg %p1291_p11 }
  0x16   : > { %p1089_p0 = pnand %p1088_p13, %p1087_p12 }
  0x18   : > { %p1090_p3 = pneg %p1089_p0 }
  0x1a   : > { %p1095_p7 = pnand %p1093_p5, %p1090_p3 }
  0x1c   : > { %1098 = shalt.err (!%p1095_p7)
}
  0x1d   : > { %s1099_s3 = scalar_lea.vmem %s1284_s19, 1024  ;;  %p1107_p2 = scmp.lt.s32.totalorder %s1284_s19, %s1284_s19 }
  0x1e   : > { %p1100_p9 = scmp.ne.s32.totalorder %s1284_s19, %s1099_s3  ;;  %p1108_p6 = scmp.lt.s32.totalorder %s1099_s3, %s1099_s3 }
  0x20   : > { %p1102_p10 = pnand %p1100_p9, %p1088_p13  ;;  %p1109_p4 = por %p1108_p6, %p1107_p2 }
  0x22   : > { %p1103_p1 = pneg %p1102_p10 }
  0x24   : > { %p1110_p8 = pnand %p1109_p4, %p1103_p1 }
  0x26   : > { %1113 = shalt.err (!%p1110_p8)
}
  0x27   : > { %s1217_s4 = smov 64   ;;  %s1218_s5 = smov 4  }
  0x28   : > { %1026 = dma.hbm_to_vmem [thread:$0]  (!%p1291_p11), %s1496_s1, 1024, %s1284_s19, [#allocation6], %s1217_s4, %s1217_s4, %s1218_s5  }
  0x29   : > { %p24_p2 = scmp.eq.s32.totalorder %s23_s23, 0  ;;  %p33_p1 = scmp.ne.s32.totalorder %s1210_s11, %s1206_s10 }
  0x2a   : > { %p34_p4 = scmp.eq.s32.totalorder %s1214_s12, 0  ;;  %p1036_p6 = scmp.lt.s32.totalorder %s1214_s12, 2 }
  0x2b   : > { %s1327_s8 = scalar_select %p24_p2, %s1210_s11, %s26_s22  }
  0x2c   : > { %p35_p8 = por %p34_p4, %p33_p1  ;;  %p1505_p10 = scmp.eq.s32.totalorder %s1261_s13, 1 }
  0x2d   : > { %s123_s18 = sand.u32 1, %s1210_s11   ;;  %s798_s24 = sshll.u32 %s1214_s12, 12 }
  0x2e   : > { %p1331_p12 = por %p1505_p10, %p33_p1  ;;  %s746_s25 = sshll.u32 %s123_s18, 8 }
  0x2f   : > { %s1340_s27 = scalar_lea.hbm %s1495_s0, %s798_s24  ;;  %s127_s19 = scalar_lea.vmem [#allocation2], %s746_s25 }
  0x30   : > { %s134_s22 = sshll.u32 %s127_s19, 4  ;;  %p1342_p11 = pnand %p1036_p6, %p35_p8  ;;  %s1346_s22 = int_to_ptr.vmem [resolvable:$true] %s134_s22 }
  0x31   : > { %s1348_s28 = scalar_lea.sflag [#allocation3], %s123_s18  ;;  %s1114_s29 = scalar_lea.hbm %s1340_s27, 4096 }
  0x32   : > { %p1115_p13 = scmp.ne.s32.totalorder %s1340_s27, %s1114_s29  ;;  %p1116_p0 = pneg %p1342_p11 }
  0x33   : > { %s1119_s4 = scalar_lea.hbm %s1495_s0, 8192  ;;  %p1120_p7 = scmp.lt.u32.totalorder %s1340_s27, %s1495_s0 }
  0x34   : > { %p1117_p3 = pnand %p1116_p0, %p1115_p13  ;;  %p1121_p9 = scmp.lt.u32.totalorder %s1119_s4, %s1114_s29 }
  0x35   : > { %p1123_p1 = scmp.lt.u32.totalorder %s1114_s29, %s1340_s27 }
  0x36   : > { %p1118_p5 = pneg %p1117_p3  ;;  %p1122_p2 = por %p1121_p9, %p1120_p7 }
  0x38   : > { %p1124_p4 = por %p1123_p1, %p1122_p2 }
  0x3a   : > { %p1125_p6 = pnand %p1124_p4, %p1118_p5 }
  0x3c   : > { %1128 = shalt.err (!%p1125_p6)
}
  0x3d   : > { %s1129_s7 = scalar_lea.vmem %s1346_s22, 4096  ;;  %s1219_s18 = smov [#allocation2]  }
  0x3e   : > { %p1130_p8 = scmp.ne.s32.totalorder %s1346_s22, %s1129_s7  ;;  %s1134_s24 = sshll.u32 %s1219_s18, 4  ;;  %s1135_s24 = int_to_ptr.vmem [resolvable:$false] %s1134_s24 }
  0x3f   : > { %s1136_s25 = scalar_lea.vmem %s1135_s24, 8192  ;;  %p1137_p3 = scmp.lt.s32.totalorder %s1346_s22, %s1135_s24 }
  0x40   : > { %p1132_p10 = pnand %p1130_p8, %p1116_p0  ;;  %p1138_p7 = scmp.lt.s32.totalorder %s1136_s25, %s1129_s7 }
  0x42   : > { %p1133_p13 = pneg %p1132_p10  ;;  %p1139_p9 = por %p1138_p7, %p1137_p3 }
  0x44   : > { %p1140_p2 = pnand %p1139_p9, %p1133_p13 }
  0x46   : > { %1143 = shalt.err (!%p1140_p2)
}
  0x47   : > { %s1220_s20 = smov 128   ;;  %s1221_s26 = smov 8  }
  0x48   : > { %1030 = dma.hbm_to_vmem [thread:$0]  (!%p1342_p11), %s1340_s27, 4096, %s1346_s22, %s1348_s28, %s1220_s20, %s1220_s20, %s1221_s26  }
  0x49   : > { %p1508_p0 = scmp.ne.s32.totalorder %s1503_s17, 0 }
  0x4a   : > { %s1379_s19 = sand.u32 (!%p1508_p0), 1, %s1206_s10   ;;  %p1509_p5 = scmp.ne.s32.totalorder (!%p1508_p0), %s1501_s15, 0 }
  0x4b   : > { %146 = sbr.rel (%p1508_p0) target bundleno = 375 (0x177), region = 28  ;;  %s750_s29 = sshll.u32 (!%p1508_p0), %s1379_s19, 8 }
  0x4c   : > { %s149_s30 = scalar_lea.sflag (!%p1508_p0), [#allocation3], %s1379_s19  ;;  %s1383_s3 = scalar_lea.vmem (!%p1508_p0), [#allocation2], %s750_s29 }
  0x52   : > { %1189 = dma.done.wait (%p1509_p5), %s149_s30, 4096  }
  0x53   : > { %1191 = vsyncadd (%p1509_p5), %s149_s30, 4294963200  ;;  %p1510_p11 = scmp.eq.s32.totalorder %s1261_s13, 0 }
  0x55   : > { %1193 = dma.done.wait (%p1510_p11), [#allocation6], 1024   ;;  %p1511_p1 = pmov %p1510_p11 }
  0x56   : > { %v1078_v0 = vld [vmem:[#allocation5] sm:$0xff]   ;;  %v1079_v1 = vld [vmem:[#allocation5 + $0x8] sm:$0xff]   ;;  %v1080_v2 = vld [vmem:[#allocation5 + $0x10] sm:$0xff]   ;;  %s752_s15 = sshll.u32 %s1379_s19, 7  ;;  %s831_s27 = sshll.u32 %s1261_s13, 11 }
  0x57   : > { %1195 = vsyncadd (%p1511_p1), [#allocation6], 4294966272  ;;  %951 = vmatprep.subr.bf16.mxu0 %v1078_v0  ;;  %999 = vmatprep.subr.bf16.mxu1 %v1078_v0  ;;  %v1081_v3 = vld [vmem:[#allocation5 + $0x18] sm:$0xff]   ;;  %v180_v4 = vld [vmem:[%s1383_s3] sm:$0xff]  ;;  %s1426_s17 = scalar_lea.vmem [#allocation7], %s752_s15  ;;  %s1445_s4 = scalar_lea.hbm %s1497_s2, %s831_s27 }
  0x58   : > { %952 = vmatpush3.bf16.msra.mxu0 %v1078_v0  ;;  %1007 = vmatpush3.bf16.msra.mxu1 %v1078_v0  ;;  %v181_v5 = vld [vmem:[%s1383_s3 + $0x8] sm:$0xff]  ;;  %v196_v6 = vld [vmem:[%s1383_s3 + $0x80] sm:$0xff]  ;;  %v212_v7 = vmul.f32 %v180_v4, %v180_v4  ;;  %v1084_v16 = vld [vmem:[#allocation5 + $0x30] sm:$0xff]   ;;  %s659_s22 = sshll.u32 %s1426_s17, 4  ;;  %s646_s13 = scalar_lea.sflag [#allocation4], %s1379_s19  ;;  %s1447_s22 = int_to_ptr.vmem [resolvable:$true] %s659_s22 }
  0x59   : > { %953 = vmatprep.subr.bf16.mxu0 %v1079_v1  ;;  %1000 = vmatprep.subr.bf16.mxu1 %v1079_v1  ;;  %v213_v8 = vmul.f32 %v181_v5, %v181_v5  ;;  %v197_v9 = vld [vmem:[%s1383_s3 + $0x88] sm:$0xff]  ;;  %v228_v10 = vmul.f32 %v196_v6, %v196_v6  ;;  %v1082_v13 = vld [vmem:[#allocation5 + $0x20] sm:$0xff]   ;;  %v1085_v17 = vld [vmem:[#allocation5 + $0x38] sm:$0xff]   ;;  %s1144_s5 = scalar_lea.vmem %s1447_s22, 2048  ;;  %s1222_s6 = smov [#allocation7]  }
  0x5a   : > { %v229_v11 = vmul.f32 %v197_v9, %v197_v9  ;;  %v1083_v15 = vld [vmem:[#allocation5 + $0x28] sm:$0xff]   ;;  %v182_v18 = vld [vmem:[%s1383_s3 + $0x10] sm:$0xff]  ;;  %v183_v19 = vld [vmem:[%s1383_s3 + $0x18] sm:$0xff]  ;;  %p1145_p4 = scmp.ne.s32.totalorder %s1447_s22, %s1144_s5  ;;  %s1148_s7 = sshll.u32 %s1222_s6, 4  ;;  %s1149_s7 = int_to_ptr.vmem [resolvable:$false] %s1148_s7 }
  0x5b   : > { %v244_v12 = vpack.c.bf16 %v213_v8, %v212_v7  ;;  %v198_v20 = vld [vmem:[%s1383_s3 + $0x90] sm:$0xff]  ;;  %v199_v21 = vld [vmem:[%s1383_s3 + $0x98] sm:$0xff]  ;;  %v184_v22 = vld [vmem:[%s1383_s3 + $0x20] sm:$0xff]  ;;  %v214_v26 = vmul.f32 %v182_v18, %v182_v18  ;;  %v215_v27 = vmul.f32 %v183_v19, %v183_v19  ;;  %s1150_s18 = scalar_lea.vmem %s1149_s7, 4096  ;;  %p1151_p10 = scmp.lt.s32.totalorder %s1447_s22, %s1149_s7 }
  0x5c   : > { %954 = vmatpush3.bf16.msra.mxu0 %v1079_v1  ;;  %1008 = vmatpush3.bf16.msra.mxu1 %v1079_v1  ;;  %v252_v14 = vpack.c.bf16 %v229_v11, %v228_v10  ;;  %v185_v23 = vld [vmem:[%s1383_s3 + $0x28] sm:$0xff]  ;;  %v200_v24 = vld [vmem:[%s1383_s3 + $0xa0] sm:$0xff]  ;;  %v230_v28 = vmul.f32 %v198_v20, %v198_v20  ;;  %v231_v29 = vmul.f32 %v199_v21, %v199_v21  ;;  %v186_v36 = vld [vmem:[%s1383_s3 + $0x30] sm:$0xff]  ;;  %p1146_p6 = pnand %p1145_p4, %p1331_p12  ;;  %p1152_p13 = scmp.lt.s32.totalorder %s1150_s18, %s1144_s5 }
  0x5d   : > { %955 = vmatprep.subr.bf16.mxu0 %v1080_v2  ;;  %1001 = vmatprep.subr.bf16.mxu1 %v1080_v2  ;;  %v201_v25 = vld [vmem:[%s1383_s3 + $0xa8] sm:$0xff]  ;;  %v216_v30 = vmul.f32 %v184_v22, %v184_v22  ;;  %v217_v31 = vmul.f32 %v185_v23, %v185_v23  ;;  %v232_v32 = vmul.f32 %v200_v24, %v200_v24  ;;  %v187_v37 = vld [vmem:[%s1383_s3 + $0x38] sm:$0xff]  ;;  %v202_v40 = vld [vmem:[%s1383_s3 + $0xb0] sm:$0xff] }
  0x5e   : > { %967 = vmatprep.mubr.bf16.mxu0 %v244_v12  ;;  %983 = vmatprep.mubr.bf16.mxu1 %v252_v14  ;;  %v233_v33 = vmul.f32 %v201_v25, %v201_v25  ;;  %v245_v34 = vpack.c.bf16 %v215_v27, %v214_v26  ;;  %v253_v35 = vpack.c.bf16 %v231_v29, %v230_v28  ;;  %v203_v41 = vld [vmem:[%s1383_s3 + $0xb8] sm:$0xff]  ;;  %v188_v42 = vld [vmem:[%s1383_s3 + $0x40] sm:$0xff]  ;;  %v189_v43 = vld [vmem:[%s1383_s3 + $0x48] sm:$0xff]  ;;  %p1147_p8 = pneg %p1146_p6  ;;  %p1153_p3 = por %p1152_p13, %p1151_p10 }
  0x5f   : > { %v246_v38 = vpack.c.bf16 %v217_v31, %v216_v30  ;;  %v204_v44 = vld [vmem:[%s1383_s3 + $0xc0] sm:$0xff]  ;;  %v205_v45 = vld [vmem:[%s1383_s3 + $0xc8] sm:$0xff]  ;;  %v218_v46 = vmul.f32 %v186_v36, %v186_v36  ;;  %v219_v47 = vmul.f32 %v187_v37, %v187_v37  ;;  %v234_v48 = vmul.f32 %v202_v40, %v202_v40  ;;  %v190_v56 = vld [vmem:[%s1383_s3 + $0x50] sm:$0xff] }
  0x60   : > { %956 = vmatpush3.bf16.msra.mxu0 %v1080_v2  ;;  %1009 = vmatpush3.bf16.msra.mxu1 %v1080_v2  ;;  %v254_v39 = vpack.c.bf16 %v233_v33, %v232_v32  ;;  %v235_v49 = vmul.f32 %v203_v41, %v203_v41  ;;  %v220_v50 = vmul.f32 %v188_v42, %v188_v42  ;;  %v191_v57 = vld [vmem:[%s1383_s3 + $0x58] sm:$0xff]  ;;  %v206_v60 = vld [vmem:[%s1383_s3 + $0xd0] sm:$0xff]  ;;  %v192_v62 = vld [vmem:[%s1383_s3 + $0x60] sm:$0xff]  ;;  %p1154_p7 = pnand %p1153_p3, %p1147_p8 }
  0x61   : > { %957 = vmatprep.subr.bf16.mxu0 %v1081_v3  ;;  %1002 = vmatprep.subr.bf16.mxu1 %v1081_v3  ;;  %v221_v51 = vmul.f32 %v189_v43, %v189_v43  ;;  %v236_v52 = vmul.f32 %v204_v44, %v204_v44  ;;  %v237_v53 = vmul.f32 %v205_v45, %v205_v45  ;;  %v207_v61 = vld [vmem:[%s1383_s3 + $0xd8] sm:$0xff]  ;;  %v193_v63 = vld [vmem:[%s1383_s3 + $0x68] sm:$0xff]  ;;  %v208_v0 = vld [vmem:[%s1383_s3 + $0xe0] sm:$0xff] }
  0x62   : > { %v247_v54 = vpack.c.bf16 %v219_v47, %v218_v46  ;;  %v255_v55 = vpack.c.bf16 %v235_v49, %v234_v48  ;;  %v209_v1 = vld [vmem:[%s1383_s3 + $0xe8] sm:$0xff]  ;;  %v222_v2 = vmul.f32 %v190_v56, %v190_v56  ;;  %v238_v4 = vmul.f32 %v206_v60, %v206_v60  ;;  %v194_v12 = vld [vmem:[%s1383_s3 + $0x70] sm:$0xff] }
  0x63   : > { %v248_v58 = vpack.c.bf16 %v221_v51, %v220_v50  ;;  %v256_v59 = vpack.c.bf16 %v237_v53, %v236_v52  ;;  %v239_v5 = vmul.f32 %v207_v61, %v207_v61  ;;  %v224_v6 = vmul.f32 %v192_v62, %v192_v62 }
  0x64   : > { %958 = vmatpush3.bf16.msra.mxu0 %v1081_v3  ;;  %1010 = vmatpush3.bf16.msra.mxu1 %v1081_v3  ;;  %v223_v3 = vmul.f32 %v191_v57, %v191_v57  ;;  %v225_v7 = vmul.f32 %v193_v63, %v193_v63  ;;  %v240_v8 = vmul.f32 %v208_v0, %v208_v0 }
  0x65   : > { %959 = vmatprep.subr.bf16.mxu0 %v1082_v13  ;;  %1003 = vmatprep.subr.bf16.mxu1 %v1082_v13  ;;  %v241_v9 = vmul.f32 %v209_v1, %v209_v1  ;;  %v257_v11 = vpack.c.bf16 %v239_v5, %v238_v4  ;;  %v226_v18 = vmul.f32 %v194_v12, %v194_v12 }
  0x66   : > { %v249_v10 = vpack.c.bf16 %v223_v3, %v222_v2 }
  0x67   : > { %v258_v14 = vpack.c.bf16 %v241_v9, %v240_v8 }
  0x68   : > { %960 = vmatpush3.bf16.msra.mxu0 %v1082_v13  ;;  %1011 = vmatpush3.bf16.msra.mxu1 %v1082_v13  ;;  %v250_v13 = vpack.c.bf16 %v225_v7, %v224_v6 }
  0x69   : > { %961 = vmatprep.subr.bf16.mxu0 %v1083_v15  ;;  %1004 = vmatprep.subr.bf16.mxu1 %v1083_v15 }
  0x6c   : > { %962 = vmatpush3.bf16.msra.mxu0 %v1083_v15  ;;  %1012 = vmatpush3.bf16.msra.mxu1 %v1083_v15  ;;  %v195_v15 = vld [vmem:[%s1383_s3 + $0x78] sm:$0xff] }
  0x6d   : > { %963 = vmatprep.subr.bf16.mxu0 %v1084_v16  ;;  %1005 = vmatprep.subr.bf16.mxu1 %v1084_v16  ;;  %v227_v19 = vmul.f32 %v195_v15, %v195_v15 }
  0x6f   : > { %v251_v22 = vpack.c.bf16 %v227_v19, %v226_v18 }
  0x70   : > { %964 = vmatpush3.bf16.msra.mxu0 %v1084_v16  ;;  %1013 = vmatpush3.bf16.msra.mxu1 %v1084_v16  ;;  %v210_v16 = vld [vmem:[%s1383_s3 + $0xf0] sm:$0xff] }
  0x71   : > { %965 = vmatprep.subr.bf16.mxu0 %v1085_v17  ;;  %1006 = vmatprep.subr.bf16.mxu1 %v1085_v17  ;;  %v242_v20 = vmul.f32 %v210_v16, %v210_v16 }
  0x74   : > { %966 = vmatpush3.bf16.msra.mxu0 %v1085_v17  ;;  %1014 = vmatpush3.bf16.msra.mxu1 %v1085_v17  ;;  %v211_v17 = vld [vmem:[%s1383_s3 + $0xf8] sm:$0xff] }
  0x75   : > { %v243_v21 = vmul.f32 %v211_v17, %v211_v17 }
  0x77   : > { %968 = vmatmul.mubr.bf16.vlgmr.msra.gmra.mrb[0].mxu0 %v245_v34  ;;  %984 = vmatmul.mubr.bf16.vlgmr.msra.gmra.mrb[0].mxu1 %v253_v35  ;;  %v259_v23 = vpack.c.bf16 %v243_v21, %v242_v20 }
  0x78   : > { %971 = vmatprep.mubr.bf16.mxu0 %v246_v38  ;;  %987 = vmatprep.mubr.bf16.mxu1 %v254_v39 }
  0x7f   : > { %972 = vmatmul.mubr.bf16.gmra.mrb[4].mxu0 %v247_v54  ;;  %988 = vmatmul.mubr.bf16.gmra.mrb[4].mxu1 %v255_v55 }
  0x80   : > { %975 = vmatprep.mubr.bf16.mxu0 %v248_v58  ;;  %991 = vmatprep.mubr.bf16.mxu1 %v256_v59 }
  0x87   : > { %976 = vmatmul.mubr.bf16.gmra.mrb[8].mxu0 %v249_v10  ;;  %992 = vmatmul.mubr.bf16.gmra.mrb[8].mxu1 %v257_v11 }
  0x88   : > { %979 = vmatprep.mubr.bf16.mxu0 %v250_v13  ;;  %995 = vmatprep.mubr.bf16.mxu1 %v258_v14 }
  0x8f   : > { %980 = vmatmul.mubr.bf16.gmra.mrb[12].mxu0 %v251_v22  ;;  %996 = vmatmul.mubr.bf16.gmra.mrb[12].mxu1 %v259_v23 }
 0x14a   : > { %v969_v24 = vpop.f32.mrb[0].mxu0  ;;  %v985_v25 = vpop.f32.mrb[0].mxu1 }
 0x14b   : > { %v358_v26 = vpop.f32.mrb[1].mxu0  ;;  %v422_v27 = vpop.f32.mrb[1].mxu1 }
 0x14c   : > { %v970_v28 = vpop.f32.mrb[2].mxu0  ;;  %v986_v29 = vpop.f32.mrb[2].mxu1 }
 0x14d   : > { %v840_v30 = vpack.c.bf16 %v970_v28, %v969_v24  ;;  %v880_v31 = vpack.c.bf16 %v986_v29, %v985_v25  ;;  %v361_v32 = vpop.f32.mrb[3].mxu0  ;;  %v425_v33 = vpop.f32.mrb[3].mxu1 }
 0x14e   : > { %v835_v34 = vpack.c.bf16 %v361_v32, %v358_v26  ;;  %v875_v35 = vpack.c.bf16 %v425_v33, %v422_v27 }
 0x14f   : > { %912 = vst [vmem:[%s1426_s17 + $0x8] sm:$0xff] %v840_v30   ;;  %920 = vst [vmem:[%s1426_s17 + $0x48] sm:$0xff] %v880_v31  }
 0x150   : > { %836 = vst [vmem:[%s1426_s17] sm:$0xff] %v835_v34   ;;  %919 = vst [vmem:[%s1426_s17 + $0x40] sm:$0xff] %v875_v35  }
 0x152   : > { %v973_v36 = vpop.f32.mrb[4].mxu0  ;;  %v989_v37 = vpop.f32.mrb[4].mxu1 }
 0x153   : > { %v374_v38 = vpop.f32.mrb[5].mxu0  ;;  %v438_v39 = vpop.f32.mrb[5].mxu1 }
 0x154   : > { %v974_v40 = vpop.f32.mrb[6].mxu0  ;;  %v990_v41 = vpop.f32.mrb[6].mxu1 }
 0x155   : > { %v850_v42 = vpack.c.bf16 %v974_v40, %v973_v36  ;;  %v890_v43 = vpack.c.bf16 %v990_v41, %v989_v37  ;;  %v377_v44 = vpop.f32.mrb[7].mxu0  ;;  %v441_v45 = vpop.f32.mrb[7].mxu1 }
 0x156   : > { %v845_v46 = vpack.c.bf16 %v377_v44, %v374_v38  ;;  %v885_v47 = vpack.c.bf16 %v441_v45, %v438_v39 }
 0x157   : > { %914 = vst [vmem:[%s1426_s17 + $0x18] sm:$0xff] %v850_v42   ;;  %922 = vst [vmem:[%s1426_s17 + $0x58] sm:$0xff] %v890_v43  }
 0x158   : > { %913 = vst [vmem:[%s1426_s17 + $0x10] sm:$0xff] %v845_v46   ;;  %921 = vst [vmem:[%s1426_s17 + $0x50] sm:$0xff] %v885_v47  }
 0x15a   : > { %v977_v48 = vpop.f32.mrb[8].mxu0  ;;  %v993_v49 = vpop.f32.mrb[8].mxu1 }
 0x15b   : > { %v390_v50 = vpop.f32.mrb[9].mxu0  ;;  %v454_v51 = vpop.f32.mrb[9].mxu1 }
 0x15c   : > { %v978_v52 = vpop.f32.mrb[10].mxu0  ;;  %v994_v53 = vpop.f32.mrb[10].mxu1 }
 0x15d   : > { %v860_v54 = vpack.c.bf16 %v978_v52, %v977_v48  ;;  %v900_v55 = vpack.c.bf16 %v994_v53, %v993_v49  ;;  %v393_v56 = vpop.f32.mrb[11].mxu0  ;;  %v457_v57 = vpop.f32.mrb[11].mxu1 }
 0x15e   : > { %v855_v58 = vpack.c.bf16 %v393_v56, %v390_v50  ;;  %v895_v59 = vpack.c.bf16 %v457_v57, %v454_v51 }
 0x15f   : > { %916 = vst [vmem:[%s1426_s17 + $0x28] sm:$0xff] %v860_v54   ;;  %924 = vst [vmem:[%s1426_s17 + $0x68] sm:$0xff] %v900_v55  }
 0x160   : > { %915 = vst [vmem:[%s1426_s17 + $0x20] sm:$0xff] %v855_v58   ;;  %923 = vst [vmem:[%s1426_s17 + $0x60] sm:$0xff] %v895_v59  }
 0x162   : > { %v981_v60 = vpop.f32.mrb[12].mxu0  ;;  %v997_v61 = vpop.f32.mrb[12].mxu1 }
 0x163   : > { %v406_v62 = vpop.f32.mrb[13].mxu0  ;;  %v470_v63 = vpop.f32.mrb[13].mxu1 }
 0x164   : > { %v982_v0 = vpop.f32.mrb[14].mxu0  ;;  %v998_v1 = vpop.f32.mrb[14].mxu1 }
 0x165   : > { %v870_v2 = vpack.c.bf16 %v982_v0, %v981_v60  ;;  %v910_v3 = vpack.c.bf16 %v998_v1, %v997_v61  ;;  %v409_v4 = vpop.f32.mrb[15].mxu0  ;;  %v473_v5 = vpop.f32.mrb[15].mxu1 }
 0x166   : > { %v865_v6 = vpack.c.bf16 %v409_v4, %v406_v62  ;;  %v905_v7 = vpack.c.bf16 %v473_v5, %v470_v63 }
 0x167   : > { %918 = vst [vmem:[%s1426_s17 + $0x38] sm:$0xff] %v870_v2   ;;  %926 = vst [vmem:[%s1426_s17 + $0x78] sm:$0xff] %v910_v3  }
 0x168   : > { %917 = vst [vmem:[%s1426_s17 + $0x30] sm:$0xff] %v865_v6   ;;  %925 = vst [vmem:[%s1426_s17 + $0x70] sm:$0xff] %v905_v7  }
 0x169   : > { %1157 = shalt.err (!%p1154_p7)
}
 0x16a   : > { %s1158_s24 = scalar_lea.hbm %s1445_s4, 2048  ;;  %s1162_s26 = scalar_lea.hbm %s1497_s2, 4096 }
 0x16b   : > { %p1159_p9 = scmp.ne.s32.totalorder %s1445_s4, %s1158_s24  ;;  %p1163_p5 = scmp.lt.u32.totalorder %s1445_s4, %s1497_s2 }
 0x16c   : > { %p1164_p11 = scmp.lt.u32.totalorder %s1162_s26, %s1158_s24  ;;  %p1166_p4 = scmp.lt.u32.totalorder %s1158_s24, %s1445_s4 }
 0x16d   : > { %p1160_p2 = pnand %p1159_p9, %p1331_p12 }
 0x16e   : > { %p1165_p1 = por %p1164_p11, %p1163_p5 }
 0x16f   : > { %p1161_p0 = pneg %p1160_p2 }
 0x170   : > { %p1167_p6 = por %p1166_p4, %p1165_p1 }
 0x172   : > { %p1168_p8 = pnand %p1167_p6, %p1161_p0 }
 0x174   : > { %1171 = shalt.err (!%p1168_p8)
}
 0x175   : > { %s1223_s3 = smov 64   ;;  %s1224_s15 = smov 4  }
 0x176   : > { %1021 = dma.vmem_to_hbm [thread:$0]  (%p1331_p12), %s1447_s22, 2048, %s1445_s4, %s646_s13, %s1223_s3, %s1223_s3, %s1224_s15  }
 0x177 PF: > { %s674_s17 = sand.u32 1, %s1202_s9   ;;  %p1512_p10 = scmp.ne.s32.totalorder %s1502_s16, 0 }
 0x178   : > { %p1513_p13 = scmp.ge.s32.totalorder %s1214_s12, 2  ;;  %s675_s27 = scalar_lea.sflag [#allocation4], %s674_s17 }
 0x17a   : > { %p1032_p3 = pnand %p1513_p13, %p1512_p10 }
 0x17c   : > { %1197 = dma.done.wait (!%p1032_p3), %s675_s27, 2048  }
 0x17d   : > { %1199 = vsyncadd (!%p1032_p3), %s675_s27, 4294965248  ;;  %p16_p7 = scmp.ge.s32.totalorder %s1296_s21, 4   ;;  %s1514_s9 = smov %s1206_s10 }
 0x17e   : > { %s1515_s10 = smov %s1210_s11  ;;  %s1516_s11 = smov %s1327_s8 }
 0x17f   : > { %s1517_s12 = smov %s1296_s21  ;;  %18 = sbr.rel (!%p16_p7) target bundleno = 6 (0x6), region = 77 }
 0x186   :  { %680 = vsyncpa [#allocation3], 1 }
 0x187   :  { %682 = vsyncpa [#allocation3 + $0x1], 1 }
 0x188   :  { %683 = vsyncpa [#allocation6], 1 }
 0x189   :  { %684 = vsyncpa [#allocation4], 1 }
 0x18a   :  { %686 = vsyncpa [#allocation4 + $0x1], 1 }

</bundles_post_ra>
